<compile_context>
chip_gen: v5e
topology: v5e:2x2
jax: 0.10.0
libtpu: 0.0.40
codegen_flags: <defaults>
</compile_context>

<pallas_src>
import functools
import math

import jax
import jax.numpy as jnp
from jax.experimental import pallas as pl
from jax.experimental.pallas import tpu as pltpu

EPS = 1e-5


def basic_block_kernel(x_ref, wb1_ref, g1_ref, b1_ref, wb2_ref, g2_ref, b2_ref,
                       mup_ref, mdn_ref, o_ref, *, Cp):
    """Fused BasicBlock forward in the folded (B*H, W*Cp) lane-dense layout.

    x_ref     : (B*H, W*Cp) f32      activations, channels zero-padded to Cp
    wb*_ref   : (3*W*Cp, W*Cp) bf16  kh-fused block-tridiagonal conv weights
    g*_/b*_   : (1, W*Cp) f32        BN affine params, lane-replicated over W
    mup/mdn   : (B*H, 1) f32         1.0 where row h-1 / h+1 is inside the image
    o_ref     : (B*H, W*Cp) f32
    """
    BH, WC = x_ref.shape
    W = WC // Cp
    inv_count = 1.0 / float(BH * W)          # 1 / (B*H*W) elements per channel

    x = x_ref[...]                           # (BH, WC) f32, read once
    m_up = mup_ref[...]                      # (BH, 1) f32
    m_dn = mdn_ref[...]                      # (BH, 1) f32

    def conv3x3(a, wb_ref):
        # kh taps via sublane rotations (XLU) + precomputed image-edge masks.
        a_up = pltpu.roll(a, shift=1, axis=0) * m_up          # row h-1 (kh=0)
        a_dn = pltpu.roll(a, shift=BH - 1, axis=0) * m_dn     # row h+1 (kh=2)
        # Fuse the three kh taps into the contraction dim: K = 3*WC.
        lhs = jnp.concatenate(
            [a_up.astype(jnp.bfloat16),
             a.astype(jnp.bfloat16),
             a_dn.astype(jnp.bfloat16)], axis=1)              # (BH, 3*WC) bf16
        return jnp.dot(lhs, wb_ref[...],
                       preferred_element_type=jnp.float32)    # (BH, WC) f32

    def group_sum_lanes(v):
        # v: (1, WC).  Returns (1, WC) where every lane w*Cp+c holds the sum of
        # v over all w' at channel c (per-channel total, lane-replicated).
        # Circular lane rolls keep channel alignment (shift multiples of Cp).
        if W & (W - 1) == 0:                 # log2(W) doubling steps
            s = v
            shift = Cp
            while shift < WC:
                s = s + pltpu.roll(s, shift=shift, axis=1)
                shift *= 2
            return s
        s = v
        for k in range(1, W):                # general fallback, W-1 roll+adds
            s = s + pltpu.roll(v, shift=k * Cp, axis=1)
        return s

    def batchnorm(acc, g_ref, b_ref):
        # Exact f32 batch stats, centered (two-pass) variance, no MXU involved.
        col = jnp.sum(acc, axis=0, keepdims=True)             # (1, WC)
        mean_l = group_sum_lanes(col) * inv_count             # (1, WC)
        d = acc - mean_l                                      # centered, reused below
        colsq = jnp.sum(d * d, axis=0, keepdims=True)         # (1, WC)
        var_l = group_sum_lanes(colsq) * inv_count            # biased variance
        scale_l = g_ref[...] * jax.lax.rsqrt(var_l + EPS)     # (1, WC)
        return d * scale_l + b_ref[...]

    # Stage 1: conv1 -> bn1 -> relu   (kept entirely in VMEM/registers)
    y1 = jnp.maximum(batchnorm(conv3x3(x, wb1_ref), g1_ref, b1_ref), 0.0)
    # Stage 2: conv2 -> bn2 -> + identity -> relu
    y2 = batchnorm(conv3x3(y1, wb2_ref), g2_ref, b2_ref) + x
    o_ref[...] = jnp.maximum(y2, 0.0)


def _expand_conv_weight(w, W, Cp):
    """(3, 3, Cin, Cout) HWIO 3x3 weight -> (3*W*Cp, W*Cp) bf16 kh-stacked
    block-tridiagonal matrix acting on the folded (row, W*Cp) layout.

    Rows [kh*WC:(kh+1)*WC] hold the kh-th tap, where
      Wb[kh, wi*Cp+ci, wo*Cp+co] = w[kh, wi-wo+1, ci, co]  if |wi-wo| <= 1 else 0.
    """
    c_in, c_out = w.shape[2], w.shape[3]
    wp = jnp.pad(w.astype(jnp.float32),
                 ((0, 0), (0, 0), (0, Cp - c_in), (0, Cp - c_out)))
    wi = jnp.arange(W)[:, None]          # input column position
    wo = jnp.arange(W)[None, :]          # output column position
    d = wi - wo                          # valid taps: d in {-1, 0, +1}
    kw_idx = jnp.clip(d + 1, 0, 2)
    mask = (jnp.abs(d) <= 1).astype(jnp.float32)
    big = wp[:, kw_idx, :, :]                             # (3, W, W, Cp, Cp)
    big = big * mask[None, :, :, None, None]
    big = big.transpose(0, 1, 3, 2, 4).reshape(3, W * Cp, W * Cp)
    big = big.reshape(3 * W * Cp, W * Cp)                 # stack kh along K
    return big.astype(jnp.bfloat16)


@jax.jit
def basic_block_forward(x_nchw, w1, g1, b1, w2, g2, b2):
    """BasicBlock forward. x_nchw: (B, C, H, W) f32; returns (B, C, H, W) f32."""
    B, C, H, W = x_nchw.shape

    # Pad channels so the folded lane axis W*Cp is a multiple of 128.
    cmult = 128 // math.gcd(W, 128)
    Cp = -(-C // cmult) * cmult
    WC = W * Cp

    x = jnp.transpose(x_nchw, (0, 2, 3, 1)).astype(jnp.float32)   # NCHW -> NHWC
    x = jnp.pad(x, ((0, 0), (0, 0), (0, 0), (0, Cp - C)))
    x2d = x.reshape(B * H, WC)                                    # lane-dense layout

    wb1 = _expand_conv_weight(w1, W, Cp)
    wb2 = _expand_conv_weight(w2, W, Cp)

    def rep_param(v):
        vp = jnp.pad(v.reshape(-1).astype(jnp.float32), (0, Cp - C)).reshape(1, Cp)
        return jnp.tile(vp, (1, W))                               # (1, WC)

    # Image-edge masks for the kh rolls (hoisted out of the kernel).
    row = jnp.arange(B * H, dtype=jnp.int32)
    m_up = ((row % H) != 0).astype(jnp.float32).reshape(B * H, 1)
    m_dn = ((row % H) != (H - 1)).astype(jnp.float32).reshape(B * H, 1)

    flops = 2 * 2 * (B * H) * (3 * WC) * WC          # 2 convs, one K=3*WC matmul each
    bytes_accessed = 4 * 2 * (B * H) * WC + 2 * 2 * 3 * WC * WC
    cost = pl.CostEstimate(flops=int(flops), transcendentals=int(2 * WC),
                           bytes_accessed=int(bytes_accessed))

    vmem = pl.BlockSpec(memory_space=pltpu.MemorySpace.VMEM)
    out2d = pl.pallas_call(
        functools.partial(basic_block_kernel, Cp=Cp),
        out_shape=jax.ShapeDtypeStruct((B * H, WC), jnp.float32),
        in_specs=[vmem] * 9,
        out_specs=vmem,
        compiler_params=pltpu.CompilerParams(vmem_limit_bytes=32 * 1024 * 1024),
        cost_estimate=cost,
    )(x2d, wb1, rep_param(g1), rep_param(b1), wb2, rep_param(g2), rep_param(b2),
      m_up, m_dn)

    out = out2d.reshape(B, H, W, Cp)[..., :C]
    return jnp.transpose(out, (0, 3, 1, 2))                       # NHWC -> NCHW


def _reference_forward(x_nchw, w1, g1, b1, w2, g2, b2):
    """Pure-JAX reference (same math) for a sanity check."""
    def conv(a, w):
        return jax.lax.conv_general_dilated(
            a, w, (1, 1), "SAME", dimension_numbers=("NHWC", "HWIO", "NHWC"))

    def bn(a, g, b):
        mean = jnp.mean(a, axis=(0, 1, 2), keepdims=True)
        var = jnp.mean((a - mean) ** 2, axis=(0, 1, 2), keepdims=True)
        return (a - mean) * jax.lax.rsqrt(var + EPS) * g.reshape(1, 1, 1, -1) \
            + b.reshape(1, 1, 1, -1)

    x = jnp.transpose(x_nchw, (0, 2, 3, 1)).astype(jnp.float32)
    out = jax.nn.relu(bn(conv(x, w1), g1, b1))
    out = bn(conv(out, w2), g2, b2) + x
    return jnp.transpose(jax.nn.relu(out), (0, 3, 1, 2))


if __name__ == "__main__":
    # Small shapes consistent with BasicBlock(in_channels=4, out_channels=4).
    B, C, H, W = 2, 4, 16, 16

    key = jax.random.PRNGKey(0)
    kx, kw1, kw2 = jax.random.split(key, 3)

    x = jax.random.normal(kx, (B, C, H, W), jnp.float32)

    # Conv weights in HWIO layout: (3, 3, Cin, Cout); kaiming-like scale.
    fan_in = 3 * 3 * C
    w1 = jax.random.normal(kw1, (3, 3, C, C), jnp.float32) * (2.0 / fan_in) ** 0.5
    w2 = jax.random.normal(kw2, (3, 3, C, C), jnp.float32) * (2.0 / fan_in) ** 0.5

    # BatchNorm affine params at their nn.BatchNorm2d defaults.
    g1 = jnp.ones((C,), jnp.float32)
    b1 = jnp.zeros((C,), jnp.float32)
    g2 = jnp.ones((C,), jnp.float32)
    b2 = jnp.zeros((C,), jnp.float32)

    out = jax.block_until_ready(basic_block_forward(x, w1, g1, b1, w2, g2, b2))
    ref = _reference_forward(x, w1, g1, b1, w2, g2, b2)

    assert out.shape == (B, C, H, W)
    assert jnp.allclose(out, ref, rtol=5e-2, atol=5e-2), "mismatch vs JAX reference"

    print("KERNEL_OK")
</pallas_src>

<mosaic_0001>
module attributes {stable_mosaic.version = 11 : i64} {
  func.func @basic_block_kernel(%arg0: memref<32x128xf32, #tpu.memory_space<vmem>>, %arg1: memref<384x128xbf16, #tpu.memory_space<vmem>>, %arg2: memref<1x128xf32, #tpu.memory_space<vmem>>, %arg3: memref<1x128xf32, #tpu.memory_space<vmem>>, %arg4: memref<384x128xbf16, #tpu.memory_space<vmem>>, %arg5: memref<1x128xf32, #tpu.memory_space<vmem>>, %arg6: memref<1x128xf32, #tpu.memory_space<vmem>>, %arg7: memref<32x1xf32, #tpu.memory_space<vmem>>, %arg8: memref<32x1xf32, #tpu.memory_space<vmem>>, %arg9: memref<32x128xf32, #tpu.memory_space<vmem>>) attributes {dimension_semantics = [], scalar_prefetch = 0 : i64, scratch_operands = 0 : i64, tpu.core_type = #tpu.core_type<tc>} {
    %c0 = arith.constant 0 : index
    %c0_0 = arith.constant 0 : index
    %0 = vector.load %arg0[%c0, %c0_0] : memref<32x128xf32, #tpu.memory_space<vmem>>, vector<32x128xf32>
    %c0_1 = arith.constant 0 : index
    %c0_2 = arith.constant 0 : index
    %1 = vector.load %arg7[%c0_1, %c0_2] : memref<32x1xf32, #tpu.memory_space<vmem>>, vector<32x1xf32>
    %c0_3 = arith.constant 0 : index
    %c0_4 = arith.constant 0 : index
    %2 = vector.load %arg8[%c0_3, %c0_4] : memref<32x1xf32, #tpu.memory_space<vmem>>, vector<32x1xf32>
    %c1_i32 = arith.constant 1 : i32
    %3 = tpu.dynamic_rotate %0 by %c1_i32 dim 0 : vector<32x128xf32>, i32 -> vector<32x128xf32>
    %4 = vector.broadcast %1 : vector<32x1xf32> to vector<32x128xf32>
    %5 = arith.mulf %3, %4 : vector<32x128xf32>
    %c31_i32 = arith.constant 31 : i32
    %6 = tpu.dynamic_rotate %0 by %c31_i32 dim 0 : vector<32x128xf32>, i32 -> vector<32x128xf32>
    %7 = vector.broadcast %2 : vector<32x1xf32> to vector<32x128xf32>
    %8 = arith.mulf %6, %7 : vector<32x128xf32>
    %9 = arith.truncf %5 : vector<32x128xf32> to vector<32x128xbf16>
    %10 = arith.truncf %0 : vector<32x128xf32> to vector<32x128xbf16>
    %11 = arith.truncf %8 : vector<32x128xf32> to vector<32x128xbf16>
    %12 = tpu.concatenate %9, %10, %11 in 1 : vector<32x128xbf16>, vector<32x128xbf16>, vector<32x128xbf16> -> vector<32x384xbf16>
    %c0_5 = arith.constant 0 : index
    %c0_6 = arith.constant 0 : index
    %13 = vector.load %arg1[%c0_5, %c0_6] : memref<384x128xbf16, #tpu.memory_space<vmem>>, vector<384x128xbf16>
    %cst = arith.constant dense<0.000000e+00> : vector<32x128xf32>
    %14 = tpu.matmul %12, %13, %cst {dimension_numbers = #tpu.dot_dimension_numbers<[1], [0], [0], [1], [0, 0, 1, 1], [], []>} : vector<32x384xbf16>, vector<384x128xbf16>, vector<32x128xf32> -> vector<32x128xf32>
    %cst_7 = arith.constant dense<0.000000e+00> : vector<128xf32>
    %15 = vector.multi_reduction <add>, %14, %cst_7 [0] : vector<32x128xf32> to vector<128xf32>
    %16 = vector.shape_cast %15 : vector<128xf32> to vector<1x128xf32>
    %c8_i32 = arith.constant 8 : i32
    %17 = tpu.dynamic_rotate %16 by %c8_i32 dim 1 : vector<1x128xf32>, i32 -> vector<1x128xf32>
    %18 = arith.addf %16, %17 : vector<1x128xf32>
    %c16_i32 = arith.constant 16 : i32
    %19 = tpu.dynamic_rotate %18 by %c16_i32 dim 1 : vector<1x128xf32>, i32 -> vector<1x128xf32>
    %20 = arith.addf %18, %19 : vector<1x128xf32>
    %c32_i32 = arith.constant 32 : i32
    %21 = tpu.dynamic_rotate %20 by %c32_i32 dim 1 : vector<1x128xf32>, i32 -> vector<1x128xf32>
    %22 = arith.addf %20, %21 : vector<1x128xf32>
    %c64_i32 = arith.constant 64 : i32
    %23 = tpu.dynamic_rotate %22 by %c64_i32 dim 1 : vector<1x128xf32>, i32 -> vector<1x128xf32>
    %24 = arith.addf %22, %23 : vector<1x128xf32>
    %cst_8 = arith.constant 0.001953125 : f32
    %25 = vector.broadcast %cst_8 : f32 to vector<1x128xf32>
    %26 = arith.mulf %24, %25 : vector<1x128xf32>
    %27 = vector.broadcast %26 : vector<1x128xf32> to vector<32x128xf32>
    %28 = arith.subf %14, %27 : vector<32x128xf32>
    %29 = arith.mulf %28, %28 : vector<32x128xf32>
    %cst_9 = arith.constant dense<0.000000e+00> : vector<128xf32>
    %30 = vector.multi_reduction <add>, %29, %cst_9 [0] : vector<32x128xf32> to vector<128xf32>
    %31 = vector.shape_cast %30 : vector<128xf32> to vector<1x128xf32>
    %c8_i32_10 = arith.constant 8 : i32
    %32 = tpu.dynamic_rotate %31 by %c8_i32_10 dim 1 : vector<1x128xf32>, i32 -> vector<1x128xf32>
    %33 = arith.addf %31, %32 : vector<1x128xf32>
    %c16_i32_11 = arith.constant 16 : i32
    %34 = tpu.dynamic_rotate %33 by %c16_i32_11 dim 1 : vector<1x128xf32>, i32 -> vector<1x128xf32>
    %35 = arith.addf %33, %34 : vector<1x128xf32>
    %c32_i32_12 = arith.constant 32 : i32
    %36 = tpu.dynamic_rotate %35 by %c32_i32_12 dim 1 : vector<1x128xf32>, i32 -> vector<1x128xf32>
    %37 = arith.addf %35, %36 : vector<1x128xf32>
    %c64_i32_13 = arith.constant 64 : i32
    %38 = tpu.dynamic_rotate %37 by %c64_i32_13 dim 1 : vector<1x128xf32>, i32 -> vector<1x128xf32>
    %39 = arith.addf %37, %38 : vector<1x128xf32>
    %cst_14 = arith.constant 0.001953125 : f32
    %40 = vector.broadcast %cst_14 : f32 to vector<1x128xf32>
    %41 = arith.mulf %39, %40 : vector<1x128xf32>
    %c0_15 = arith.constant 0 : index
    %c0_16 = arith.constant 0 : index
    %42 = vector.load %arg2[%c0_15, %c0_16] : memref<1x128xf32, #tpu.memory_space<vmem>>, vector<1x128xf32>
    %cst_17 = arith.constant 9.99999974E-6 : f32
    %43 = vector.broadcast %cst_17 : f32 to vector<1x128xf32>
    %44 = arith.addf %41, %43 : vector<1x128xf32>
    %45 = math.rsqrt %44 : vector<1x128xf32>
    %46 = arith.mulf %42, %45 : vector<1x128xf32>
    %47 = vector.broadcast %46 : vector<1x128xf32> to vector<32x128xf32>
    %48 = arith.mulf %28, %47 : vector<32x128xf32>
    %c0_18 = arith.constant 0 : index
    %c0_19 = arith.constant 0 : index
    %49 = vector.load %arg3[%c0_18, %c0_19] : memref<1x128xf32, #tpu.memory_space<vmem>>, vector<1x128xf32>
    %50 = vector.broadcast %49 : vector<1x128xf32> to vector<32x128xf32>
    %51 = arith.addf %48, %50 : vector<32x128xf32>
    %cst_20 = arith.constant 0.000000e+00 : f32
    %52 = vector.broadcast %cst_20 : f32 to vector<32x128xf32>
    %53 = arith.maximumf %51, %52 : vector<32x128xf32>
    %c1_i32_21 = arith.constant 1 : i32
    %54 = tpu.dynamic_rotate %53 by %c1_i32_21 dim 0 : vector<32x128xf32>, i32 -> vector<32x128xf32>
    %55 = vector.broadcast %1 : vector<32x1xf32> to vector<32x128xf32>
    %56 = arith.mulf %54, %55 : vector<32x128xf32>
    %c31_i32_22 = arith.constant 31 : i32
    %57 = tpu.dynamic_rotate %53 by %c31_i32_22 dim 0 : vector<32x128xf32>, i32 -> vector<32x128xf32>
    %58 = vector.broadcast %2 : vector<32x1xf32> to vector<32x128xf32>
    %59 = arith.mulf %57, %58 : vector<32x128xf32>
    %60 = arith.truncf %56 : vector<32x128xf32> to vector<32x128xbf16>
    %61 = arith.truncf %53 : vector<32x128xf32> to vector<32x128xbf16>
    %62 = arith.truncf %59 : vector<32x128xf32> to vector<32x128xbf16>
    %63 = tpu.concatenate %60, %61, %62 in 1 : vector<32x128xbf16>, vector<32x128xbf16>, vector<32x128xbf16> -> vector<32x384xbf16>
    %c0_23 = arith.constant 0 : index
    %c0_24 = arith.constant 0 : index
    %64 = vector.load %arg4[%c0_23, %c0_24] : memref<384x128xbf16, #tpu.memory_space<vmem>>, vector<384x128xbf16>
    %cst_25 = arith.constant dense<0.000000e+00> : vector<32x128xf32>
    %65 = tpu.matmul %63, %64, %cst_25 {dimension_numbers = #tpu.dot_dimension_numbers<[1], [0], [0], [1], [0, 0, 1, 1], [], []>} : vector<32x384xbf16>, vector<384x128xbf16>, vector<32x128xf32> -> vector<32x128xf32>
    %cst_26 = arith.constant dense<0.000000e+00> : vector<128xf32>
    %66 = vector.multi_reduction <add>, %65, %cst_26 [0] : vector<32x128xf32> to vector<128xf32>
    %67 = vector.shape_cast %66 : vector<128xf32> to vector<1x128xf32>
    %c8_i32_27 = arith.constant 8 : i32
    %68 = tpu.dynamic_rotate %67 by %c8_i32_27 dim 1 : vector<1x128xf32>, i32 -> vector<1x128xf32>
    %69 = arith.addf %67, %68 : vector<1x128xf32>
    %c16_i32_28 = arith.constant 16 : i32
    %70 = tpu.dynamic_rotate %69 by %c16_i32_28 dim 1 : vector<1x128xf32>, i32 -> vector<1x128xf32>
    %71 = arith.addf %69, %70 : vector<1x128xf32>
    %c32_i32_29 = arith.constant 32 : i32
    %72 = tpu.dynamic_rotate %71 by %c32_i32_29 dim 1 : vector<1x128xf32>, i32 -> vector<1x128xf32>
    %73 = arith.addf %71, %72 : vector<1x128xf32>
    %c64_i32_30 = arith.constant 64 : i32
    %74 = tpu.dynamic_rotate %73 by %c64_i32_30 dim 1 : vector<1x128xf32>, i32 -> vector<1x128xf32>
    %75 = arith.addf %73, %74 : vector<1x128xf32>
    %cst_31 = arith.constant 0.001953125 : f32
    %76 = vector.broadcast %cst_31 : f32 to vector<1x128xf32>
    %77 = arith.mulf %75, %76 : vector<1x128xf32>
    %78 = vector.broadcast %77 : vector<1x128xf32> to vector<32x128xf32>
    %79 = arith.subf %65, %78 : vector<32x128xf32>
    %80 = arith.mulf %79, %79 : vector<32x128xf32>
    %cst_32 = arith.constant dense<0.000000e+00> : vector<128xf32>
    %81 = vector.multi_reduction <add>, %80, %cst_32 [0] : vector<32x128xf32> to vector<128xf32>
    %82 = vector.shape_cast %81 : vector<128xf32> to vector<1x128xf32>
    %c8_i32_33 = arith.constant 8 : i32
    %83 = tpu.dynamic_rotate %82 by %c8_i32_33 dim 1 : vector<1x128xf32>, i32 -> vector<1x128xf32>
    %84 = arith.addf %82, %83 : vector<1x128xf32>
    %c16_i32_34 = arith.constant 16 : i32
    %85 = tpu.dynamic_rotate %84 by %c16_i32_34 dim 1 : vector<1x128xf32>, i32 -> vector<1x128xf32>
    %86 = arith.addf %84, %85 : vector<1x128xf32>
    %c32_i32_35 = arith.constant 32 : i32
    %87 = tpu.dynamic_rotate %86 by %c32_i32_35 dim 1 : vector<1x128xf32>, i32 -> vector<1x128xf32>
    %88 = arith.addf %86, %87 : vector<1x128xf32>
    %c64_i32_36 = arith.constant 64 : i32
    %89 = tpu.dynamic_rotate %88 by %c64_i32_36 dim 1 : vector<1x128xf32>, i32 -> vector<1x128xf32>
    %90 = arith.addf %88, %89 : vector<1x128xf32>
    %cst_37 = arith.constant 0.001953125 : f32
    %91 = vector.broadcast %cst_37 : f32 to vector<1x128xf32>
    %92 = arith.mulf %90, %91 : vector<1x128xf32>
    %c0_38 = arith.constant 0 : index
    %c0_39 = arith.constant 0 : index
    %93 = vector.load %arg5[%c0_38, %c0_39] : memref<1x128xf32, #tpu.memory_space<vmem>>, vector<1x128xf32>
    %cst_40 = arith.constant 9.99999974E-6 : f32
    %94 = vector.broadcast %cst_40 : f32 to vector<1x128xf32>
    %95 = arith.addf %92, %94 : vector<1x128xf32>
    %96 = math.rsqrt %95 : vector<1x128xf32>
    %97 = arith.mulf %93, %96 : vector<1x128xf32>
    %98 = vector.broadcast %97 : vector<1x128xf32> to vector<32x128xf32>
    %99 = arith.mulf %79, %98 : vector<32x128xf32>
    %c0_41 = arith.constant 0 : index
    %c0_42 = arith.constant 0 : index
    %100 = vector.load %arg6[%c0_41, %c0_42] : memref<1x128xf32, #tpu.memory_space<vmem>>, vector<1x128xf32>
    %101 = vector.broadcast %100 : vector<1x128xf32> to vector<32x128xf32>
    %102 = arith.addf %99, %101 : vector<32x128xf32>
    %103 = arith.addf %102, %0 : vector<32x128xf32>
    %cst_43 = arith.constant 0.000000e+00 : f32
    %104 = vector.broadcast %cst_43 : f32 to vector<32x128xf32>
    %105 = arith.maximumf %103, %104 : vector<32x128xf32>
    %c0_44 = arith.constant 0 : index
    %c0_45 = arith.constant 0 : index
    %106 = vector.load %arg9[%c0_44, %c0_45] : memref<32x128xf32, #tpu.memory_space<vmem>>, vector<32x128xf32>
    tpu.vector_store %arg9[%c0_44, %c0_45], %105 {strides = array<i32>} : memref<32x128xf32, #tpu.memory_space<vmem>>, vector<32x128xf32>,
    return
  }
}

</mosaic_0001>

<bundles_post_ra>
// kernel: basic_block_forward.1
= control target key start
LH: loop header
LB: loop body
LE: loop exit
PB: predicated region body
PF: predicated region fallthrough
CT: control target
= control target key end

     0   :  { %v1182_v0 = vmov 0   ;;  %v48_v44 = vlaneseq  ;;  %s1185_s14 = smov 32   ;;  %s1186_s15 = smov 64   ;;  %s1573_s8 = inlined_call_operand.vmem [shape: f32[32,1], index: 8, kind: input, shape index: {}]   ;;  %s1574_s7 = inlined_call_operand.vmem [shape: f32[32,1], index: 7, kind: input, shape index: {}]   ;;  %s1575_s1 = inlined_call_operand.vmem [shape: bf16[384,128], index: 1, kind: input, shape index: {}]   ;;  %s1576_s0 = inlined_call_operand.vmem [shape: f32[32,128], index: 0, kind: input, shape index: {}]   ;;  %s1577_s3 = inlined_call_operand.vmem [shape: f32[1,128], index: 3, kind: input, shape index: {}]   ;;  %s1578_s4 = inlined_call_operand.vmem [shape: bf16[384,128], index: 4, kind: input, shape index: {}]   ;;  %s1579_s2 = inlined_call_operand.vmem [shape: f32[1,128], index: 2, kind: input, shape index: {}]   ;;  %s1580_s6 = inlined_call_operand.vmem [shape: f32[1,128], index: 6, kind: input, shape index: {}]   ;;  %s1581_s5 = inlined_call_operand.vmem [shape: f32[1,128], index: 5, kind: input, shape index: {}]   ;;  %s1582_s9 = inlined_call_operand.vmem [shape: f32[32,128], index: 9, kind: output, shape index: {}]  }
   0x1   :  { %1174 = vset.pattern.permute.xlu1 %v1182_v0  ;;  %1173 = vset.pattern.permute.xlu0 %v1182_v0  ;;  %v40_v1 = vld [vmem:[%s1573_s8] sm:$0xff]  ;;  %v42_v3 = vld [vmem:[%s1573_s8 + $0x10] sm:$0xff]  ;;  %v1119_v4 = vld [vmem:[%s1575_s1 + $0x78] sm:$0xff] }
   0x2   :  { %v36_v2 = vld [vmem:[%s1574_s7] sm:$0xff]  ;;  %90 = vperm.xlu0 %1173, %v40_v1   ;;  %1175 = vset.pattern.permute.xlu2 %v1182_v0  ;;  %v1111_v5 = vld [vmem:[%s1575_s1 + $0x38] sm:$0xff]  ;;  %v1118_v7 = vld [vmem:[%s1575_s1 + $0x70] sm:$0xff]  ;;  %v1361_v48 = vshrl.u32 %v48_v44, 7 }
   0x3   :  { %57 = vperm.xlu1 %1174, %v36_v2   ;;  %100 = vperm.xlu2 %1175, %v42_v3   ;;  %v1127_v6 = vld [vmem:[%s1575_s1 + $0xb8] sm:$0xff]  ;;  %v41_v8 = vld [vmem:[%s1573_s8 + $0x8] sm:$0xff]  ;;  %v1110_v10 = vld [vmem:[%s1575_s1 + $0x30] sm:$0xff] }
   0x4   :  { %371 = vmatpush.bf16.msra.mxu1 %v1119_v4  ;;  %352 = vmatpush.bf16.msra.mxu0 %v1111_v5  ;;  %v37_v9 = vld [vmem:[%s1574_s7 + $0x8] sm:$0xff]  ;;  %v1126_v11 = vld [vmem:[%s1575_s1 + $0xb0] sm:$0xff]  ;;  %v43_v12 = vld [vmem:[%s1573_s8 + $0x18] sm:$0xff]  ;;  %vm83_vm0 = vcmp.lt.s32.totalorder %v1361_v48, 7  ;;  %vm50_vm1 = vcmp.lt.s32.totalorder %v1361_v48, 1 }
   0x5   :  { %390 = vmatpush.bf16.msra.mxu2 %v1127_v6  ;;  %v1117_v13 = vld [vmem:[%s1575_s1 + $0x68] sm:$0xff]  ;;  %v1116_v16 = vld [vmem:[%s1575_s1 + $0x60] sm:$0xff]  ;;  %v38_v17 = vld [vmem:[%s1574_s7 + $0x10] sm:$0xff] }
   0x6   :  { %v1109_v14 = vld [vmem:[%s1575_s1 + $0x28] sm:$0xff]  ;;  %v39_v18 = vld [vmem:[%s1574_s7 + $0x18] sm:$0xff]  ;;  %v1108_v19 = vld [vmem:[%s1575_s1 + $0x20] sm:$0xff] }
   0x7   :  { %v1125_v15 = vld [vmem:[%s1575_s1 + $0xa8] sm:$0xff]  ;;  %v1124_v20 = vld [vmem:[%s1575_s1 + $0xa0] sm:$0xff]  ;;  %v1115_v21 = vld [vmem:[%s1575_s1 + $0x58] sm:$0xff] }
   0x8   :  { %372 = vmatpush.bf16.msra.mxu1 %v1118_v7  ;;  %353 = vmatpush.bf16.msra.mxu0 %v1110_v10  ;;  %v1107_v22 = vld [vmem:[%s1575_s1 + $0x18] sm:$0xff]  ;;  %v1114_v23 = vld [vmem:[%s1575_s1 + $0x50] sm:$0xff]  ;;  %v1113_v26 = vld [vmem:[%s1575_s1 + $0x48] sm:$0xff] }
   0x9   :  { %391 = vmatpush.bf16.msra.mxu2 %v1126_v11  ;;  %v1123_v24 = vld [vmem:[%s1575_s1 + $0x98] sm:$0xff]  ;;  %v1106_v25 = vld [vmem:[%s1575_s1 + $0x10] sm:$0xff]  ;;  %v1321_v28 = vld [vmem:[%s1576_s0] sm:$0xff] }
   0xa   :  { %95 = vperm.xlu0 %1173, %v41_v8   ;;  %v1122_v27 = vld [vmem:[%s1575_s1 + $0x90] sm:$0xff]  ;;  %v1326_v29 = vld [vmem:[%s1576_s0 + $0x8] sm:$0xff]  ;;  %v116_v30 = vpack.c.bf16 %v1321_v28, %v1321_v28  ;;  %v1112_v33 = vld [vmem:[%s1575_s1 + $0x40] sm:$0xff]  ;;  %v79_v49 = vrot.slane %v1321_v28, 1  ;;  %v44_v51 = vrot.slane %v1321_v28, 7 }
   0xb   :  { %62 = vperm.xlu1 %1174, %v37_v9   ;;  %105 = vperm.xlu2 %1175, %v43_v12   ;;  %v117_v31 = vpack.c.bf16 %v1326_v29, %v1326_v29  ;;  %v1105_v32 = vld [vmem:[%s1575_s1 + $0x8] sm:$0xff]  ;;  %v1104_v38 = vld [vmem:[%s1575_s1] sm:$0xff]  ;;  %v1350_v40 = vld [vmem:[%s1576_s0 + $0x18] sm:$0xff]  ;;  %v80_v50 = vrot.slane %v1326_v29, 1  ;;  %v45_v58 = vrot.slane %v1326_v29, 7 }
   0xc   :  { %373 = vmatpush.bf16.msra.mxu1 %v1117_v13  ;;  %354 = vmatpush.bf16.msra.mxu0 %v1109_v14  ;;  %v1121_v34 = vld [vmem:[%s1575_s1 + $0x88] sm:$0xff]  ;;  %v140_v35 = vunpack.c.l.b16 %v116_v30  ;;  %v1120_v39 = vld [vmem:[%s1575_s1 + $0x80] sm:$0xff]  ;;  %v1355_v41 = vld [vmem:[%s1576_s0 + $0x10] sm:$0xff]  ;;  %v119_v43 = vpack.c.bf16 %v1350_v40, %v1350_v40  ;;  %v47_v52 = vrot.slane %v1350_v40, 7  ;;  %v82_v8 = vrot.slane %v1350_v40, 1  ;;  %s1183_s0 = smov 8  }
   0xd   :  { %392 = vmatpush.bf16.msra.mxu2 %v1125_v15  ;;  %v141_v36 = vunpack.c.l.b16 %v117_v31  ;;  %v118_v42 = vpack.c.bf16 %v1355_v41, %v1355_v41  ;;  %v86_v55 = vsel %vm83_vm0, %v79_v49, %v80_v50  ;;  %v81_v57 = vrot.slane %v1355_v41, 1  ;;  %s1184_s1 = smov 16  }
   0xe   :  { %v143_v46 = vunpack.c.l.b16 %v119_v43  ;;  %v54_v56 = vsel %vm50_vm1, %v47_v52, %v44_v51  ;;  %v53_v63 = vsel %vm50_vm1, %v44_v51, %v45_v58  ;;  %v46_v9 = vrot.slane %v1355_v41, 7 }
   0xf   :  { %v144_v37 = vpack.c.b16 %v141_v36, %v140_v35  ;;  %v142_v45 = vunpack.c.l.b16 %v118_v42  ;;  %v85_v62 = vsel %vm83_vm0, %v80_v50, %v81_v57 }
  0x10   :  { %374 = vmatpush.bf16.msra.mxu1 %v1116_v16  ;;  %355 = vmatpush.bf16.msra.mxu0 %v1108_v19 }
  0x11   :  { %393 = vmatpush.bf16.msra.mxu2 %v1124_v20  ;;  %v145_v47 = vpack.c.b16 %v143_v46, %v142_v45  ;;  %v52_v20 = vsel %vm50_vm1, %v45_v58, %v46_v9 }
  0x12   :  { %67 = vperm.xlu0 %1173, %v38_v17   ;;  %v84_v17 = vsel %vm83_vm0, %v81_v57, %v82_v8 }
  0x13   :  { %72 = vperm.xlu1 %1174, %v39_v18   ;;  %v87_v18 = vsel %vm83_vm0, %v82_v8, %v79_v49 }
  0x14   :  { %375 = vmatpush.bf16.msra.mxu1 %v1115_v21  ;;  %356 = vmatpush.bf16.msra.mxu0 %v1107_v22  ;;  %v51_v22 = vsel %vm50_vm1, %v46_v9, %v47_v52 }
  0x15   :  { %394 = vmatpush.bf16.msra.mxu2 %v1123_v24 }
  0x18   :  { %376 = vmatpush.bf16.msra.mxu1 %v1114_v23  ;;  %357 = vmatpush.bf16.msra.mxu0 %v1106_v25 }
  0x19   :  { %395 = vmatpush.bf16.msra.mxu2 %v1122_v27 }
  0x1c   :  { %377 = vmatpush.bf16.msra.mxu1 %v1113_v26  ;;  %358 = vmatpush.bf16.msra.mxu0 %v1105_v32 }
  0x1d   :  { %396 = vmatpush.bf16.msra.mxu2 %v1121_v34 }
  0x20   :  { %378 = vmatpush.bf16.msra.mxu1 %v1112_v33  ;;  %359 = vmatpush.bf16.msra.mxu0 %v1104_v38 }
  0x21   :  { %397 = vmatpush.bf16.msra.mxu2 %v1120_v39 }
  0x23   :  { %379 = vmatmul.bf16.vlgmr.msra.gmra.mxu1 %v144_v37 }
  0x33   :  { %384 = vmatmul.bf16.gmra.mxu1 %v145_v47 }
  0x5d   :  { %v1381_v61 = vpop.permute.xlu2 %100 }
  0x5e   :  { %v110_v23 = vmul.f32 %v1381_v61, %v84_v17 }
  0x60   :  { %v122_v27 = vpack.c.bf16 %v110_v23, %v110_v23 }
  0x62   :  { %v154_v33 = vunpack.c.l.b16 %v122_v27 }
  0x65   :  { %v1395_v14 = vpop.permute.xlu2 %105 }
  0x66   :  { %v111_v24 = vmul.f32 %v1395_v14, %v87_v18 }
  0x68   :  { %v123_v30 = vpack.c.bf16 %v111_v24, %v111_v24 }
  0x6a   :  { %v155_v34 = vunpack.c.l.b16 %v123_v30 }
  0x6c   :  { %v157_v38 = vpack.c.b16 %v155_v34, %v154_v33 }
  0x74   :  { %v1369_v53 = vpop.permute.xlu0 %90 }
  0x75   :  { %v1371_v54 = vpop.permute.xlu1 %57  ;;  %v108_v59 = vmul.f32 %v1369_v53, %v86_v55 }
  0x76   :  { %v75_v60 = vmul.f32 %v1371_v54, %v54_v56 }
  0x77   :  { %v120_v2 = vpack.c.bf16 %v108_v59, %v108_v59 }
  0x78   :  { %v112_v3 = vpack.c.bf16 %v75_v60, %v75_v60 }
  0x79   :  { %v152_v10 = vunpack.c.l.b16 %v120_v2 }
  0x7a   :  { %v128_v11 = vunpack.c.l.b16 %v112_v3 }
  0x7c   :  { %v1387_v0 = vpop.permute.xlu0 %95 }
  0x7d   :  { %v1389_v1 = vpop.permute.xlu1 %62  ;;  %v109_v4 = vmul.f32 %v1387_v0, %v85_v62 }
  0x7e   :  { %v76_v5 = vmul.f32 %v1389_v1, %v53_v63 }
  0x7f   :  { %v121_v6 = vpack.c.bf16 %v109_v4, %v109_v4 }
  0x80   :  { %v113_v7 = vpack.c.bf16 %v76_v5, %v76_v5 }
  0x81   :  { %v153_v12 = vunpack.c.l.b16 %v121_v6 }
  0x82   :  { %v129_v13 = vunpack.c.l.b16 %v113_v7 }
  0x83   :  { %v156_v16 = vpack.c.b16 %v153_v12, %v152_v10 }
  0x84   :  { %v132_v15 = vpack.c.b16 %v129_v13, %v128_v11  ;;  %v1401_v19 = vpop.permute.xlu0 %67 }
  0x85   :  { %v1405_v21 = vpop.permute.xlu1 %72  ;;  %398 = vmatmul.bf16.vlgmr.msra.gmra.mxu2 %v156_v16  ;;  %v77_v25 = vmul.f32 %v1401_v19, %v52_v20 }
  0x86   :  { %360 = vmatmul.bf16.vlgmr.msra.gmra.mxu0 %v132_v15  ;;  %v78_v26 = vmul.f32 %v1405_v21, %v51_v22 }
  0x87   :  { %v114_v31 = vpack.c.bf16 %v77_v25, %v77_v25 }
  0x88   :  { %v115_v32 = vpack.c.bf16 %v78_v26, %v78_v26 }
  0x89   :  { %v130_v35 = vunpack.c.l.b16 %v114_v31 }
  0x8a   :  { %v131_v36 = vunpack.c.l.b16 %v115_v32 }
  0x8c   :  { %v133_v37 = vpack.c.b16 %v131_v36, %v130_v35 }
  0x95   :  { %403 = vmatmul.bf16.gmra.mxu2 %v157_v38 }
  0x96   :  { %365 = vmatmul.bf16.gmra.mxu0 %v133_v37 }
  0xa0   :  { %v380_v39 = vpop.f32.mrf.mxu1 }
  0xa8   :  { %v382_v44 = vpop.f32.mrf.mxu1 }
  0xb0   :  { %v385_v49 = vpop.f32.mrf.mxu1 }
  0xb8   :  { %v387_v60 = vpop.f32.mrf.mxu1 }
 0x103   :  { %v361_v42 = vpop.f32.mrf.mxu0 }
 0x104   :  { %v381_v52 = vadd.f32 %v380_v39, %v361_v42 }
 0x108   :  { %v399_v43 = vpop.f32.mrf.mxu2 }
 0x109   :  { %v400_v58 = vadd.f32 %v399_v43, %v381_v52 }
 0x10b   :  { %v363_v45 = vpop.f32.mrf.mxu0 }
 0x10c   :  { %v383_v51 = vadd.f32 %v382_v44, %v363_v45 }
 0x110   :  { %v401_v46 = vpop.f32.mrf.mxu2 }
 0x111   :  { %v402_v55 = vadd.f32 %v401_v46, %v383_v51 }
 0x113   :  { %v366_v47 = vpop.f32.mrf.mxu0  ;;  %v409_v62 = vadd.f32 %v402_v55, %v400_v58 }
 0x114   :  { %v386_v56 = vadd.f32 %v385_v49, %v366_v47 }
 0x118   :  { %v404_v50 = vpop.f32.mrf.mxu2 }
 0x119   :  { %v405_v59 = vadd.f32 %v404_v50, %v386_v56  ;;  %v1142_v56 = vld [vmem:[%s1578_s4 + $0x70] sm:$0xff] }
 0x11b   :  { %v368_v57 = vpop.f32.mrf.mxu0  ;;  %v410_v3 = vadd.f32 %v409_v62, %v405_v59  ;;  %v1150_v62 = vld [vmem:[%s1578_s4 + $0xb0] sm:$0xff] }
 0x11c   :  { %v388_v63 = vadd.f32 %v387_v60, %v368_v57  ;;  %v1135_v57 = vld [vmem:[%s1578_s4 + $0x38] sm:$0xff]  ;;  %v1134_v60 = vld [vmem:[%s1578_s4 + $0x30] sm:$0xff] }
 0x11d   :  { %758 = vmatpush.bf16.msra.mxu3 %v1135_v57 }
 0x120   :  { %v406_v2 = vpop.f32.mrf.mxu2 }
 0x121   :  { %v407_v4 = vadd.f32 %v406_v2, %v388_v63  ;;  %759 = vmatpush.bf16.msra.mxu3 %v1134_v60  ;;  %v1140_v63 = vld [vmem:[%s1578_s4 + $0x60] sm:$0xff]  ;;  %v1133_v2 = vld [vmem:[%s1578_s4 + $0x28] sm:$0xff] }
 0x123   :  { %v411_v5 = vadd.f32 %v410_v3, %v407_v4  ;;  %v1149_v3 = vld [vmem:[%s1578_s4 + $0xa8] sm:$0xff] }
 0x125   :  { %v412_v6 = vrot.slane %v411_v5, 4  ;;  %760 = vmatpush.bf16.msra.mxu3 %v1133_v2 }
 0x127   :  { %v413_v7 = vadd.f32 %v412_v6, %v411_v5  ;;  %v1132_v5 = vld [vmem:[%s1578_s4 + $0x20] sm:$0xff] }
 0x128   :  { %v1148_v6 = vld [vmem:[%s1578_s4 + $0xa0] sm:$0xff] }
 0x129   :  { %v414_v8 = vrot.slane %v413_v7, 2  ;;  %761 = vmatpush.bf16.msra.mxu3 %v1132_v5 }
 0x12b   :  { %v415_v9 = vadd.f32 %v414_v8, %v413_v7  ;;  %v1138_v7 = vld [vmem:[%s1578_s4 + $0x50] sm:$0xff]  ;;  %v1131_v8 = vld [vmem:[%s1578_s4 + $0x18] sm:$0xff] }
 0x12d   :  { %v416_v10 = vrot.slane %v415_v9, 1  ;;  %762 = vmatpush.bf16.msra.mxu3 %v1131_v8 }
 0x12f   :  { %v417_v11 = vadd.f32 %v416_v10, %v415_v9  ;;  %v1147_v9 = vld [vmem:[%s1578_s4 + $0x98] sm:$0xff]  ;;  %v1137_v10 = vld [vmem:[%s1578_s4 + $0x48] sm:$0xff] }
 0x131   :  { %418 = vrot.lane.b32.xlu2 %v417_v11, %s1183_s0 }
 0x18b   :  { %v419_v12 = vpop.permute.xlu2 %418 }
 0x18c   :  { %v420_v13 = vadd.f32 %v419_v12, %v417_v11  ;;  %v1130_v11 = vld [vmem:[%s1578_s4 + $0x10] sm:$0xff] }
 0x18d   :  { %v1146_v12 = vld [vmem:[%s1578_s4 + $0x90] sm:$0xff]  ;;  %763 = vmatpush.bf16.msra.mxu3 %v1130_v11 }
 0x18e   :  { %421 = vrot.lane.b32.xlu0 %v420_v13, %s1184_s1 }
 0x200   :  { %v422_v15 = vpop.permute.xlu0 %421 }
 0x201   :  { %v423_v16 = vadd.f32 %v422_v15, %v420_v13 }
 0x203   :  { %424 = vrot.lane.b32.xlu1 %v423_v16, %s1185_s14 }
 0x275   :  { %v425_v17 = vpop.permute.xlu1 %424 }
 0x276   :  { %v426_v18 = vadd.f32 %v425_v17, %v423_v16  ;;  %v1136_v16 = vld [vmem:[%s1578_s4 + $0x40] sm:$0xff] }
 0x278   :  { %427 = vrot.lane.b32.xlu2 %v426_v18, %s1186_s15 }
 0x2d2   :  { %v428_v20 = vpop.permute.xlu2 %427 }
 0x2d3   :  { %v429_v22 = vadd.f32 %v428_v20, %v426_v18  ;;  %v1129_v18 = vld [vmem:[%s1578_s4 + $0x8] sm:$0xff] }
 0x2d4   :  { %v1145_v20 = vld [vmem:[%s1578_s4 + $0x88] sm:$0xff]  ;;  %764 = vmatpush.bf16.msra.mxu3 %v1129_v18 }
 0x2d5   :  { %v430_v23 = vmul.f32 0.001953125, %v429_v22 }
 0x2d7   :  { %v431_v24 = vperm.slane %v430_v23, 0  ;;  %v1128_v23 = vld [vmem:[%s1578_s4] sm:$0xff] }
 0x2d8   :  { %765 = vmatpush.bf16.msra.mxu3 %v1128_v23 }
 0x2d9   :  { %v1417_v25 = vsub.f32 %v400_v58, %v431_v24  ;;  %v1419_v26 = vsub.f32 %v402_v55, %v431_v24  ;;  %v1421_v27 = vsub.f32 %v405_v59, %v431_v24  ;;  %v1423_v30 = vsub.f32 %v407_v4, %v431_v24  ;;  %v1143_v55 = vld [vmem:[%s1578_s4 + $0x78] sm:$0xff]  ;;  %v1141_v59 = vld [vmem:[%s1578_s4 + $0x68] sm:$0xff]  ;;  %v1144_v24 = vld [vmem:[%s1578_s4 + $0x80] sm:$0xff] }
 0x2da   :  { %777 = vmatpush.bf16.msrb.mxu0 %v1143_v55  ;;  %1152 = vmatpush.bf16.msrb.mxu2 %v1143_v55  ;;  %v1151_v58 = vld [vmem:[%s1578_s4 + $0xb8] sm:$0xff] }
 0x2db   :  { %v436_v31 = vmul.f32 %v1417_v25, %v1417_v25  ;;  %v437_v32 = vmul.f32 %v1419_v26, %v1419_v26  ;;  %v438_v33 = vmul.f32 %v1421_v27, %v1421_v27  ;;  %v439_v35 = vmul.f32 %v1423_v30, %v1423_v30  ;;  %796 = vmatpush.bf16.msrb.mxu1 %v1151_v58  ;;  %v1139_v4 = vld [vmem:[%s1578_s4 + $0x58] sm:$0xff] }
 0x2dc   :  { %1160 = vmatpush.bf16.msrb.mxu3 %v1151_v58 }
 0x2dd   :  { %v440_v34 = vadd.f32 %v437_v32, %v436_v31 }
 0x2de   :  { %778 = vmatpush.bf16.msrb.mxu0 %v1142_v56  ;;  %1153 = vmatpush.bf16.msrb.mxu2 %v1142_v56 }
 0x2df   :  { %v441_v36 = vadd.f32 %v440_v34, %v438_v33  ;;  %797 = vmatpush.bf16.msrb.mxu1 %v1150_v62 }
 0x2e0   :  { %1161 = vmatpush.bf16.msrb.mxu3 %v1150_v62 }
 0x2e1   :  { %v442_v37 = vadd.f32 %v441_v36, %v439_v35  ;;  %v462_v36 = vld [vmem:[%s1579_s2] sm:$0x1] }
 0x2e2   :  { %779 = vmatpush.bf16.msrb.mxu0 %v1141_v59  ;;  %1154 = vmatpush.bf16.msrb.mxu2 %v1141_v59 }
 0x2e3   :  { %v443_v38 = vrot.slane %v442_v37, 4  ;;  %798 = vmatpush.bf16.msrb.mxu1 %v1149_v3 }
 0x2e4   :  { %1162 = vmatpush.bf16.msrb.mxu3 %v1149_v3 }
 0x2e5   :  { %v444_v39 = vadd.f32 %v443_v38, %v442_v37 }
 0x2e6   :  { %780 = vmatpush.bf16.msrb.mxu0 %v1140_v63  ;;  %1155 = vmatpush.bf16.msrb.mxu2 %v1140_v63 }
 0x2e7   :  { %v445_v42 = vrot.slane %v444_v39, 2  ;;  %799 = vmatpush.bf16.msrb.mxu1 %v1148_v6 }
 0x2e8   :  { %1163 = vmatpush.bf16.msrb.mxu3 %v1148_v6 }
 0x2e9   :  { %v446_v43 = vadd.f32 %v445_v42, %v444_v39 }
 0x2ea   :  { %781 = vmatpush.bf16.msrb.mxu0 %v1139_v4  ;;  %1156 = vmatpush.bf16.msrb.mxu2 %v1139_v4 }
 0x2eb   :  { %v447_v44 = vrot.slane %v446_v43, 1  ;;  %800 = vmatpush.bf16.msrb.mxu1 %v1147_v9 }
 0x2ec   :  { %1164 = vmatpush.bf16.msrb.mxu3 %v1147_v9 }
 0x2ed   :  { %v448_v45 = vadd.f32 %v447_v44, %v446_v43  ;;  %v1176_v43 = vld [vmem:[%s1577_s3] ss:$0 sm:$0xff] }
 0x2ee   :  { %782 = vmatpush.bf16.msrb.mxu0 %v1138_v7  ;;  %1157 = vmatpush.bf16.msrb.mxu2 %v1138_v7 }
 0x2ef   :  { %449 = vrot.lane.b32.xlu0 %v448_v45, %s1183_s0  ;;  %801 = vmatpush.bf16.msrb.mxu1 %v1146_v12 }
 0x2f0   :  { %1165 = vmatpush.bf16.msrb.mxu3 %v1146_v12 }
 0x2f2   :  { %783 = vmatpush.bf16.msrb.mxu0 %v1137_v10  ;;  %1158 = vmatpush.bf16.msrb.mxu2 %v1137_v10 }
 0x2f3   :  { %802 = vmatpush.bf16.msrb.mxu1 %v1145_v20 }
 0x2f4   :  { %1166 = vmatpush.bf16.msrb.mxu3 %v1145_v20 }
 0x2f6   :  { %784 = vmatpush.bf16.msrb.mxu0 %v1136_v16  ;;  %1159 = vmatpush.bf16.msrb.mxu2 %v1136_v16 }
 0x2f7   :  { %803 = vmatpush.bf16.msrb.mxu1 %v1144_v24 }
 0x2f8   :  { %1167 = vmatpush.bf16.msrb.mxu3 %v1144_v24 }
 0x361   :  { %v450_v46 = vpop.permute.xlu0 %449 }
 0x362   :  { %v451_v47 = vadd.f32 %v450_v46, %v448_v45 }
 0x364   :  { %452 = vrot.lane.b32.xlu1 %v451_v47, %s1184_s1 }
 0x3d6   :  { %v453_v49 = vpop.permute.xlu1 %452 }
 0x3d7   :  { %v454_v50 = vadd.f32 %v453_v49, %v451_v47 }
 0x3d9   :  { %455 = vrot.lane.b32.xlu2 %v454_v50, %s1185_s14 }
 0x433   :  { %v456_v51 = vpop.permute.xlu2 %455 }
 0x434   :  { %v457_v52 = vadd.f32 %v456_v51, %v454_v50 }
 0x436   :  { %458 = vrot.lane.b32.xlu0 %v457_v52, %s1186_s15 }
 0x4a8   :  { %v459_v13 = vpop.permute.xlu0 %458 }
 0x4a9   :  { %v460_v15 = vadd.f32 %v459_v13, %v457_v52 }
 0x4ab   :  { %v461_v17 = vmul.f32 0.001953125, %v460_v15 }
 0x4ad   :  { %v463_v22 = vadd.f32 1e-05, %v461_v17 }
 0x4af   :  { %1178 = vrsqrt.f32 %v463_v22  ;;  %vm470_vm3 = vweird.f32 %v463_v22 }
 0x4b5   :  { %v1179_v31 = vpop.eup %1178 }
 0x4b6   :  { %v465_v32 = vmul.f32 %v1179_v31, %v463_v22  ;;  %vm471_vm2 = vweird.f32 %v1179_v31 }
 0x4b7   :  { %vm472_vm4 = vmor %vm470_vm3, %vm471_vm2 }
 0x4b8   :  { %v466_v33 = vmul.f32 %v1179_v31, %v465_v32 }
 0x4ba   :  { %v467_v34 = vmul.f32 0.5, %v466_v33 }
 0x4bc   :  { %v468_v35 = vsub.f32 1.5, %v467_v34 }
 0x4be   :  { %v469_v37 = vmul.f32 %v1179_v31, %v468_v35 }
 0x4c0   :  { %v473_v38 = vsel %vm472_vm4, %v1179_v31, %v469_v37 }
 0x4c1   :  { %v474_v39 = vmul.f32 %v473_v38, %v462_v36 }
 0x4c3   :  { %v476_v42 = vperm.slane %v474_v39, 0 }
 0x4c5   :  { %v478_v44 = vmul.f32 %v476_v42, %v1417_v25  ;;  %v479_v45 = vmul.f32 %v476_v42, %v1419_v26  ;;  %v480_v46 = vmul.f32 %v476_v42, %v1421_v27  ;;  %v481_v47 = vmul.f32 %v476_v42, %v1423_v30 }
 0x4c7   :  { %v486_v49 = vadd.f32 %v1176_v43, %v478_v44  ;;  %v487_v50 = vadd.f32 %v1176_v43, %v479_v45  ;;  %v488_v51 = vadd.f32 %v1176_v43, %v480_v46  ;;  %v489_v52 = vadd.f32 %v1176_v43, %v481_v47 }
 0x4c9   :  { %v490_v55 = vmax.f32 %v486_v49, 0.0  ;;  %v491_v56 = vmax.f32 %v487_v50, 0.0  ;;  %v492_v57 = vmax.f32 %v488_v51, 0.0  ;;  %v493_v58 = vmax.f32 %v489_v52, 0.0 }
 0x4cb   :  { %v522_v59 = vpack.c.bf16 %v490_v55, %v490_v55  ;;  %v523_v60 = vpack.c.bf16 %v491_v56, %v491_v56  ;;  %v524_v62 = vpack.c.bf16 %v492_v57, %v492_v57  ;;  %v525_v63 = vpack.c.bf16 %v493_v58, %v493_v58 }
 0x4cc   :  { %v494_v25 = vrot.slane %v490_v55, 7  ;;  %v495_v2 = vrot.slane %v491_v56, 7  ;;  %v497_v26 = vrot.slane %v493_v58, 7  ;;  %v506_v3 = vrot.slane %v490_v55, 1 }
 0x4cd   :  { %v546_v27 = vunpack.c.l.b16 %v522_v59  ;;  %v547_v30 = vunpack.c.l.b16 %v523_v60  ;;  %v548_v4 = vunpack.c.l.b16 %v524_v62  ;;  %v549_v5 = vunpack.c.l.b16 %v525_v63 }
 0x4ce   :  { %v500_v6 = vsel %vm50_vm1, %v494_v25, %v495_v2  ;;  %v501_v7 = vsel %vm50_vm1, %v497_v26, %v494_v25  ;;  %v507_v8 = vrot.slane %v491_v56, 1  ;;  %v508_v9 = vrot.slane %v492_v57, 1 }
 0x4cf   :  { %v550_v10 = vpack.c.b16 %v547_v30, %v546_v27  ;;  %v551_v11 = vpack.c.b16 %v549_v5, %v548_v4  ;;  %v502_v12 = vmul.f32 %v501_v7, %v1371_v54  ;;  %v503_v13 = vmul.f32 %v500_v6, %v1389_v1 }
 0x4d0   :  { %v511_v15 = vsel %vm83_vm0, %v507_v8, %v508_v9  ;;  %v512_v16 = vsel %vm83_vm0, %v506_v3, %v507_v8  ;;  %v496_v23 = vrot.slane %v492_v57, 7  ;;  %v509_v44 = vrot.slane %v493_v58, 1 }
 0x4d1   :  { %785 = vmatmul.bf16.vlgmr.msrb.gmra.mxu0 %v550_v10  ;;  %790 = vmatmul.bf16.vlgmr.msrb.gmra.mxu2 %v551_v11  ;;  %v518_v17 = vpack.c.bf16 %v502_v12, %v502_v12  ;;  %v519_v18 = vpack.c.bf16 %v503_v13, %v503_v13  ;;  %v514_v20 = vmul.f32 %v512_v16, %v1369_v53 }
 0x4d2   :  { %v515_v22 = vmul.f32 %v511_v15, %v1387_v0  ;;  %v498_v36 = vsel %vm50_vm1, %v496_v23, %v497_v26  ;;  %v499_v24 = vsel %vm50_vm1, %v495_v2, %v496_v23  ;;  %v510_v46 = vsel %vm83_vm0, %v508_v9, %v509_v44 }
 0x4d3   :  { %v534_v31 = vunpack.c.l.b16 %v518_v17  ;;  %v535_v54 = vunpack.c.l.b16 %v519_v18  ;;  %v526_v32 = vpack.c.bf16 %v514_v20, %v514_v20  ;;  %v504_v53 = vmul.f32 %v499_v24, %v1401_v19 }
 0x4d4   :  { %v527_v1 = vpack.c.bf16 %v515_v22, %v515_v22  ;;  %v505_v0 = vmul.f32 %v498_v36, %v1405_v21  ;;  %v513_v47 = vsel %vm83_vm0, %v509_v44, %v506_v3  ;;  %v516_v49 = vmul.f32 %v510_v46, %v1381_v61 }
 0x4d5   :  { %v538_v33 = vpack.c.b16 %v535_v54, %v534_v31  ;;  %v558_v34 = vunpack.c.l.b16 %v526_v32  ;;  %v520_v38 = vpack.c.bf16 %v504_v53, %v504_v53  ;;  %v517_v19 = vmul.f32 %v513_v47, %v1395_v14 }
 0x4d6   :  { %v559_v35 = vunpack.c.l.b16 %v527_v1  ;;  %v521_v39 = vpack.c.bf16 %v505_v0, %v505_v0  ;;  %v528_v50 = vpack.c.bf16 %v516_v49, %v516_v49 }
 0x4d7   :  { %766 = vmatmul.bf16.vlgmr.msra.gmra.mxu3 %v538_v33  ;;  %v536_v42 = vunpack.c.l.b16 %v520_v38  ;;  %v529_v21 = vpack.c.bf16 %v517_v19, %v517_v19 }
 0x4d8   :  { %v562_v37 = vpack.c.b16 %v559_v35, %v558_v34  ;;  %v537_v43 = vunpack.c.l.b16 %v521_v39  ;;  %v560_v51 = vunpack.c.l.b16 %v528_v50 }
 0x4d9   :  { %v561_v52 = vunpack.c.l.b16 %v529_v21 }
 0x4da   :  { %804 = vmatmul.bf16.vlgmr.msrb.gmra.mxu1 %v562_v37  ;;  %v539_v45 = vpack.c.b16 %v537_v43, %v536_v42 }
 0x4db   :  { %v563_v55 = vpack.c.b16 %v561_v52, %v560_v51 }
 0x4e7   :  { %771 = vmatmul.bf16.gmra.mxu3 %v539_v45 }
 0x4f7   :  { %809 = vmatmul.bf16.vlgmr.msrb.gmra.mxu3 %v563_v55 }
 0x54e   :  { %v786_v59 = vpop.f32.mrf.mxu0 }
 0x554   :  { %v791_v63 = vpop.f32.mrf.mxu2 }
 0x556   :  { %v788_v48 = vpop.f32.mrf.mxu0 }
 0x557   :  { %v805_v60 = vpop.f32.mrf.mxu1 }
 0x55a   :  { %v767_v56 = vpop.f32.mrf.mxu3 }
 0x55b   :  { %v787_v26 = vadd.f32 %v786_v59, %v767_v56 }
 0x55c   :  { %v793_v4 = vpop.f32.mrf.mxu2 }
 0x55d   :  { %v806_v27 = vadd.f32 %v805_v60, %v787_v26 }
 0x55f   :  { %v807_v61 = vpop.f32.mrf.mxu1 }
 0x562   :  { %v769_v57 = vpop.f32.mrf.mxu3 }
 0x563   :  { %v789_v25 = vadd.f32 %v788_v48, %v769_v57 }
 0x565   :  { %v808_v3 = vadd.f32 %v807_v61, %v789_v25  ;;  %v868_v61 = vld [vmem:[%s1581_s5] sm:$0x1] }
 0x567   :  { %v815_v6 = vadd.f32 %v808_v3, %v806_v27 }
 0x56a   :  { %v772_v58 = vpop.f32.mrf.mxu3 }
 0x56b   :  { %v792_v14 = vadd.f32 %v791_v63, %v772_v58 }
 0x572   :  { %v774_v62 = vpop.f32.mrf.mxu3 }
 0x573   :  { %v794_v5 = vadd.f32 %v793_v4, %v774_v62 }
 0x57a   :  { %v810_v2 = vpop.f32.mrf.mxu3 }
 0x57b   :  { %v811_v30 = vadd.f32 %v810_v2, %v792_v14 }
 0x57d   :  { %v816_v8 = vadd.f32 %v815_v6, %v811_v30 }
 0x582   :  { %v812_v7 = vpop.f32.mrf.mxu3 }
 0x583   :  { %v813_v9 = vadd.f32 %v812_v7, %v794_v5 }
 0x585   :  { %v817_v10 = vadd.f32 %v816_v8, %v813_v9 }
 0x587   :  { %v818_v11 = vrot.slane %v817_v10, 4 }
 0x589   :  { %v819_v12 = vadd.f32 %v818_v11, %v817_v10 }
 0x58b   :  { %v820_v13 = vrot.slane %v819_v12, 2 }
 0x58d   :  { %v821_v15 = vadd.f32 %v820_v13, %v819_v12 }
 0x58f   :  { %v822_v16 = vrot.slane %v821_v15, 1 }
 0x591   :  { %v823_v17 = vadd.f32 %v822_v16, %v821_v15 }
 0x593   :  { %824 = vrot.lane.b32.xlu1 %v823_v17, %s1183_s0 }
 0x605   :  { %v825_v18 = vpop.permute.xlu1 %824 }
 0x606   :  { %v826_v20 = vadd.f32 %v825_v18, %v823_v17 }
 0x608   :  { %827 = vrot.lane.b32.xlu2 %v826_v20, %s1184_s1 }
 0x662   :  { %v828_v22 = vpop.permute.xlu2 %827 }
 0x663   :  { %v829_v23 = vadd.f32 %v828_v22, %v826_v20 }
 0x665   :  { %830 = vrot.lane.b32.xlu0 %v829_v23, %s1185_s14 }
 0x6d7   :  { %v831_v31 = vpop.permute.xlu0 %830 }
 0x6d8   :  { %v832_v54 = vadd.f32 %v831_v31, %v829_v23 }
 0x6da   :  { %833 = vrot.lane.b32.xlu1 %v832_v54, %s1186_s15 }
 0x74c   :  { %v834_v32 = vpop.permute.xlu1 %833 }
 0x74d   :  { %v835_v1 = vadd.f32 %v834_v32, %v832_v54 }
 0x74f   :  { %v836_v33 = vmul.f32 0.001953125, %v835_v1 }
 0x751   :  { %v837_v34 = vperm.slane %v836_v33, 0 }
 0x753   :  { %v838_v35 = vsub.f32 %v806_v27, %v837_v34  ;;  %v839_v36 = vsub.f32 %v808_v3, %v837_v34  ;;  %v840_v24 = vsub.f32 %v811_v30, %v837_v34  ;;  %v841_v37 = vsub.f32 %v813_v9, %v837_v34  ;;  %v1177_v30 = vld [vmem:[%s1580_s6] ss:$0 sm:$0xff] }
 0x755   :  { %v842_v53 = vmul.f32 %v838_v35, %v838_v35  ;;  %v843_v0 = vmul.f32 %v839_v36, %v839_v36  ;;  %v844_v38 = vmul.f32 %v840_v24, %v840_v24  ;;  %v845_v42 = vmul.f32 %v841_v37, %v841_v37 }
 0x757   :  { %v846_v39 = vadd.f32 %v843_v0, %v842_v53 }
 0x759   :  { %v847_v43 = vadd.f32 %v846_v39, %v844_v38 }
 0x75b   :  { %v848_v44 = vadd.f32 %v847_v43, %v845_v42 }
 0x75d   :  { %v849_v45 = vrot.slane %v848_v44, 4 }
 0x75f   :  { %v850_v46 = vadd.f32 %v849_v45, %v848_v44 }
 0x761   :  { %v851_v47 = vrot.slane %v850_v46, 2 }
 0x763   :  { %v852_v49 = vadd.f32 %v851_v47, %v850_v46 }
 0x765   :  { %v853_v19 = vrot.slane %v852_v49, 1 }
 0x767   :  { %v854_v50 = vadd.f32 %v853_v19, %v852_v49 }
 0x769   :  { %855 = vrot.lane.b32.xlu2 %v854_v50, %s1183_s0 }
 0x7c3   :  { %v856_v21 = vpop.permute.xlu2 %855 }
 0x7c4   :  { %v857_v51 = vadd.f32 %v856_v21, %v854_v50 }
 0x7c6   :  { %858 = vrot.lane.b32.xlu0 %v857_v51, %s1184_s1 }
 0x838   :  { %v859_v52 = vpop.permute.xlu0 %858 }
 0x839   :  { %v860_v55 = vadd.f32 %v859_v52, %v857_v51 }
 0x83b   :  { %861 = vrot.lane.b32.xlu1 %v860_v55, %s1185_s14 }
 0x8ad   :  { %v862_v56 = vpop.permute.xlu1 %861 }
 0x8ae   :  { %v863_v57 = vadd.f32 %v862_v56, %v860_v55 }
 0x8b0   :  { %864 = vrot.lane.b32.xlu2 %v863_v57, %s1186_s15 }
 0x90a   :  { %v865_v58 = vpop.permute.xlu2 %864 }
 0x90b   :  { %v866_v59 = vadd.f32 %v865_v58, %v863_v57 }
 0x90d   :  { %v867_v60 = vmul.f32 0.001953125, %v866_v59 }
 0x90f   :  { %v869_v62 = vadd.f32 1e-05, %v867_v60 }
 0x911   :  { %1180 = vrsqrt.f32 %v869_v62  ;;  %vm876_vm6 = vweird.f32 %v869_v62 }
 0x917   :  { %v1181_v63 = vpop.eup %1180 }
 0x918   :  { %v871_v48 = vmul.f32 %v1181_v63, %v869_v62  ;;  %vm877_vm5 = vweird.f32 %v1181_v63 }
 0x919   :  { %vm878_vm7 = vmor %vm876_vm6, %vm877_vm5 }
 0x91a   :  { %v872_v25 = vmul.f32 %v1181_v63, %v871_v48 }
 0x91c   :  { %v873_v2 = vmul.f32 0.5, %v872_v25 }
 0x91e   :  { %v874_v26 = vsub.f32 1.5, %v873_v2 }
 0x920   :  { %v875_v3 = vmul.f32 %v1181_v63, %v874_v26 }
 0x922   :  { %v879_v14 = vsel %vm878_vm7, %v1181_v63, %v875_v3 }
 0x923   :  { %v880_v27 = vmul.f32 %v879_v14, %v868_v61 }
 0x925   :  { %v882_v4 = vperm.slane %v880_v27, 0 }
 0x927   :  { %v884_v5 = vmul.f32 %v882_v4, %v838_v35  ;;  %v885_v6 = vmul.f32 %v882_v4, %v839_v36  ;;  %v886_v7 = vmul.f32 %v882_v4, %v840_v24  ;;  %v887_v8 = vmul.f32 %v882_v4, %v841_v37 }
 0x929   :  { %v892_v9 = vadd.f32 %v1177_v30, %v884_v5  ;;  %v893_v10 = vadd.f32 %v1177_v30, %v885_v6  ;;  %v894_v11 = vadd.f32 %v1177_v30, %v886_v7  ;;  %v895_v12 = vadd.f32 %v1177_v30, %v887_v8 }
 0x92b   :  { %v896_v13 = vadd.f32 %v892_v9, %v1321_v28  ;;  %v897_v15 = vadd.f32 %v893_v10, %v1326_v29  ;;  %v898_v16 = vadd.f32 %v894_v11, %v1355_v41  ;;  %v899_v17 = vadd.f32 %v895_v12, %v1350_v40 }
 0x92d   :  { %v900_v18 = vmax.f32 %v896_v13, 0.0  ;;  %v901_v20 = vmax.f32 %v897_v15, 0.0  ;;  %v902_v22 = vmax.f32 %v898_v16, 0.0  ;;  %v903_v23 = vmax.f32 %v899_v17, 0.0 }
 0x92f   :  { %904 = vst [vmem:[%s1582_s9] sm:$0xff] %v900_v18 }
 0x930   :  { %905 = vst [vmem:[%s1582_s9 + $0x8] sm:$0xff] %v901_v20 }
 0x931   :  { %906 = vst [vmem:[%s1582_s9 + $0x10] sm:$0xff] %v902_v22 }
 0x932   :  { %907 = vst [vmem:[%s1582_s9 + $0x18] sm:$0xff] %v903_v23 }

</bundles_post_ra>
